<compile_context>
chip_gen: v7x
topology: tpu7x:2x2x1
jax: 0.10.0
libtpu: 0.0.40
codegen_flags: <defaults>
</compile_context>

<pallas_src>
import numpy as np
import jax
import jax.numpy as jnp
from jax.experimental import pallas as pl
from jax.experimental.pallas import tpu as pltpu

BN_EPS = 1e-5
_MAX_TL = 32768                                  # lane-tile cap (keeps blocks a few MiB)
_BF16_TINY = np.float32(1.17549435e-38)          # smallest normal bf16/f32 magnitude

# Which index of lax.bitcast_convert_type(uint32 -> bf16)'s new minor dim holds the LOW
# 16 bits (little-endian memory order).  Probed once eagerly so the in-kernel packing
# order always matches the wrapper-side free bitcast.
_PACK_LOW_FIRST = bool(
    float(jax.lax.bitcast_convert_type(jnp.uint32(0x3F800000), jnp.bfloat16)[1]) == 1.0)


# ---------------------------------------------------------------------------
# Pass 1: per-batch partial Gram statistics, accumulated over the L-tile axis:
#   G_n  = sum_l x[n,:,l] x[n,:,l]^T   -> (Cin, Cin)
#   sx_n = sum_l x[n,:,l]              -> (Cin, 1)
# The batch axis is "parallel" (megacore / v7x dual-TC); L-tiles are the reduction.
# ---------------------------------------------------------------------------
def _gram_stats_kernel(x_ref, g_ref, sx_ref):
    @pl.when(pl.program_id(1) == 0)
    def _init():
        g_ref[...] = jnp.zeros_like(g_ref)
        sx_ref[...] = jnp.zeros_like(sx_ref)

    x = x_ref[0]                                           # (Cin, TL), input dtype
    g_ref[0] += jax.lax.dot_general(                       # MXU: contract the lane axis
        x, x, (((1,), (1,)), ((), ())), preferred_element_type=jnp.float32)
    sx_ref[0] += jnp.sum(x.astype(jnp.float32), axis=1, keepdims=True)


# ---------------------------------------------------------------------------
# Pass 2 helpers: fused deconv taps + BN affine (f32, post-matmul) + ReLU.
#   w_ref     : (2*Cout, Cin)  raw taps [tap0 rows ; tap1 rows] in the I/O dtype
#   scale_ref : (2*Cout, 1)    gamma / sqrt(var + eps)          (f32)
#   shift_ref : (2*Cout, 1)    bias*scale + (beta - mean*scale) (f32)
# ---------------------------------------------------------------------------
def _affine_relu(x_ref, w_ref, scale_ref, shift_ref):
    x = x_ref[0]                                           # (Cin, TL)
    acc = jax.lax.dot_general(                             # (2*Cout, TL), f32 acc
        w_ref[...], x, (((1,), (0,)), ((), ())), preferred_element_type=jnp.float32)
    return jnp.maximum(acc * scale_ref[...] + shift_ref[...], 0.0)


def _apply_split_kernel(x_ref, w_ref, scale_ref, shift_ref, y0_ref, y1_ref):
    # 32-bit I/O path: emit the two taps as separate lane-dense blocks.
    y = _affine_relu(x_ref, w_ref, scale_ref, shift_ref)
    cout = y0_ref.shape[1]
    y0_ref[0] = y[:cout].astype(y0_ref.dtype)
    y1_ref[0] = y[cout:].astype(y1_ref.dtype)


def _apply_packed_bf16_kernel(x_ref, w_ref, scale_ref, shift_ref, yu_ref):
    # bf16 I/O path: fuse the stride-2 interleave into the store by packing each
    # (even, odd) output pair into one uint32 lane.  All ops are elementwise (VPU),
    # the store stays lane-dense, and the wrapper-side unpack is a free bitcast.
    y = _affine_relu(x_ref, w_ref, scale_ref, shift_ref)
    cout = yu_ref.shape[1]
    t0 = y[:cout].astype(jnp.bfloat16).astype(jnp.float32)   # round-to-nearest bf16
    t1 = y[cout:].astype(jnp.bfloat16).astype(jnp.float32)
    # Flush bf16-subnormals so the f32 bit pattern is exactly (bf16 bits) << 16.
    t0 = jnp.where(t0 < _BF16_TINY, 0.0, t0)                  # post-ReLU: values >= 0
    t1 = jnp.where(t1 < _BF16_TINY, 0.0, t1)
    u0 = pltpu.bitcast(t0, jnp.uint32)                        # bf16 bits in the high half
    u1 = pltpu.bitcast(t1, jnp.uint32)
    if _PACK_LOW_FIRST:
        yu_ref[0] = (u0 >> 16) | u1                           # low half = tap 0 (even idx)
    else:
        yu_ref[0] = u0 | (u1 >> 16)


# ---------------------------------------------------------------------------
# Tiling / resource planning
# ---------------------------------------------------------------------------
def _plan_l_tiling(length):
    """Pick a lane tile TL (multiple of 128, <= _MAX_TL) and padded length Lp = k*TL."""
    for t in (_MAX_TL, 16384, 8192):
        if length % t == 0:
            return t, length
    if length <= 8192:
        tl = ((length + 127) // 128) * 128                 # single 128-aligned tile
        return tl, tl
    k = -(-length // 8192)                                 # ~8K-lane tiles
    tl = ((-(-length // k) + 127) // 128) * 128
    return tl, k * tl


def _vmem_limit_bytes(tl, c_in, c_out, itemsize):
    per_step = tl * c_in * itemsize + 2 * tl * c_out * itemsize   # x block + y block(s)
    # double-buffered blocks + headroom; well under v7x's 64 MiB/TC (v5e/v6e: 128 MiB).
    return int(min(max(4 * per_step + (2 << 20), 8 << 20), 48 << 20))


@jax.jit
def deconv1d_bn_forward(x_ncl, weight, bias, gamma, beta):
    """ConvTranspose1d(k=2, s=2, bias=True) + BatchNorm1d (training batch stats) + ReLU.

    x_ncl  : (N, Cin, L)      f32 or bf16 (bf16 recommended on v5e: purely BW-bound)
    weight : (Cin, Cout, 2)   PyTorch ConvTranspose1d layout
    bias, gamma, beta : (Cout,)
    Returns (N, Cout, 2*L) in x_ncl.dtype.
    """
    N, Cin, L = x_ncl.shape
    Cout = weight.shape[1]
    f32 = jnp.float32
    cdtype = x_ncl.dtype
    isz = np.dtype(cdtype).itemsize

    TL, Lp = _plan_l_tiling(L)
    if Lp != L:
        # Zero padding is exact for the Gram statistics (zeros add nothing; the count
        # below uses the true L) and the padded output columns are trimmed at the end.
        x_ncl = jnp.pad(x_ncl, ((0, 0), (0, 0), (0, Lp - L)))
    grid = (N, Lp // TL)
    x_spec = pl.BlockSpec((1, Cin, TL), lambda n, t: (n, 0, t))
    vmem = _vmem_limit_bytes(TL, Cin, Cout, isz)

    # ---- pass 1: per-batch partial input Gram statistics (reads X once) -----
    gram_cost = pl.CostEstimate(
        flops=int(2 * N * Lp * Cin * Cin + N * Lp * Cin),
        transcendentals=0,
        bytes_accessed=int(N * Cin * Lp * isz + N * (Cin * Cin + Cin) * 4))
    Gp, sxp = pl.pallas_call(
        _gram_stats_kernel,
        out_shape=(jax.ShapeDtypeStruct((N, Cin, Cin), f32),
                   jax.ShapeDtypeStruct((N, Cin, 1), f32)),
        grid=grid,
        in_specs=[x_spec],
        out_specs=(pl.BlockSpec((1, Cin, Cin), lambda n, t: (n, 0, 0)),
                   pl.BlockSpec((1, Cin, 1), lambda n, t: (n, 0, 0))),
        compiler_params=pltpu.CompilerParams(
            dimension_semantics=("parallel", "arbitrary"),
            vmem_limit_bytes=vmem),
        cost_estimate=gram_cost,
    )(x_ncl)
    G = jnp.sum(Gp, axis=0)                                # (Cin, Cin)
    sx = jnp.sum(sxp, axis=0)                              # (Cin, 1)

    # ---- closed-form BN batch stats of the conv output (tiny f32 math) ------
    W0 = weight[:, :, 0].astype(f32)                       # (Cin, Cout)
    W1 = weight[:, :, 1].astype(f32)
    b = bias.astype(f32)
    g = gamma.astype(f32)
    be = beta.astype(f32)

    cnt = jnp.asarray(2 * N * L, f32)                      # true output positions/channel
    sxv = sx[:, 0]
    sw0 = sxv @ W0
    sw1 = sxv @ W1
    s1 = sw0 + sw1 + cnt * b
    q0 = jnp.sum(W0 * (G @ W0), axis=0)
    q1 = jnp.sum(W1 * (G @ W1), axis=0)
    s2 = q0 + q1 + 2.0 * b * (sw0 + sw1) + cnt * b * b
    mean = s1 / cnt
    # E[y^2]-E[y]^2 in f32: clamp avoids NaN from cancellation (see review note).
    var = jnp.maximum(s2 / cnt - mean * mean, 0.0)
    inv_std = jax.lax.rsqrt(var + BN_EPS)
    scale = g * inv_std                                    # (Cout,)
    shift = be - mean * scale

    # Raw taps only in the I/O dtype; BN scale/shift stay f32 and apply post-matmul.
    w_taps = jnp.concatenate([W0.T, W1.T], axis=0).astype(cdtype)   # (2*Cout, Cin)
    scale2 = jnp.tile(scale, 2)[:, None]                            # (2*Cout, 1) f32
    shift2 = jnp.tile(b * scale + shift, 2)[:, None]                # (2*Cout, 1) f32

    # ---- pass 2: fused deconv + BN affine + ReLU (reads X once, writes Y once)
    apply_cost = pl.CostEstimate(
        flops=int(2 * N * Lp * Cin * 2 * Cout + 6 * N * Lp * Cout),
        transcendentals=0,
        bytes_accessed=int(N * Cin * Lp * isz + 2 * N * Cout * Lp * isz
                           + 2 * Cout * (Cin + 2) * 4))
    w_spec = pl.BlockSpec((2 * Cout, Cin), lambda n, t: (0, 0))
    v_spec = pl.BlockSpec((2 * Cout, 1), lambda n, t: (0, 0))
    apply_params = pltpu.CompilerParams(
        dimension_semantics=("parallel", "parallel"), vmem_limit_bytes=vmem)

    if cdtype == jnp.bfloat16:
        # Fully fused interleave: uint32-packed tap pairs; unpacking is a free bitcast.
        yu = pl.pallas_call(
            _apply_packed_bf16_kernel,
            out_shape=jax.ShapeDtypeStruct((N, Cout, Lp), jnp.uint32),
            grid=grid,
            in_specs=[x_spec, w_spec, v_spec, v_spec],
            out_specs=pl.BlockSpec((1, Cout, TL), lambda n, t: (n, 0, t)),
            compiler_params=apply_params,
            cost_estimate=apply_cost,
        )(x_ncl, w_taps, scale2, shift2)
        out = jax.lax.bitcast_convert_type(yu, jnp.bfloat16).reshape(N, Cout, 2 * Lp)
    else:
        # TODO(synk): fold the stride-2 tap interleave into the f32 store as well once
        # Mosaic exposes a packed-layout-safe lane riffle (a (Cout, TL, 2)->(Cout, 2*TL)
        # reshape is layout-hostile today); bf16 I/O already gets the fully fused path.
        y0, y1 = pl.pallas_call(
            _apply_split_kernel,
            out_shape=(jax.ShapeDtypeStruct((N, Cout, Lp), cdtype),
                       jax.ShapeDtypeStruct((N, Cout, Lp), cdtype)),
            grid=grid,
            in_specs=[x_spec, w_spec, v_spec, v_spec],
            out_specs=(pl.BlockSpec((1, Cout, TL), lambda n, t: (n, 0, t)),
                       pl.BlockSpec((1, Cout, TL), lambda n, t: (n, 0, t))),
            compiler_params=apply_params,
            cost_estimate=apply_cost,
        )(x_ncl, w_taps, scale2, shift2)
        out = jnp.stack([y0, y1], axis=-1).reshape(N, Cout, 2 * Lp)

    if Lp != L:
        out = out[:, :, :2 * L]
    return out


def _reference_forward(x_ncl, weight, bias, gamma, beta):
    """Pure-JAX f32 reference: ConvTranspose1d(k=2,s=2) + BN(train, biased var) + ReLU."""
    N, Cin, L = x_ncl.shape
    Cout = weight.shape[1]
    t = jnp.einsum('ncl,cok->nolk', x_ncl, weight)         # (N, Cout, L, 2)
    conv = t.reshape(N, Cout, 2 * L) + bias[None, :, None]
    mean = jnp.mean(conv, axis=(0, 2), keepdims=True)
    var = jnp.mean((conv - mean) ** 2, axis=(0, 2), keepdims=True)
    norm = (conv - mean) * jax.lax.rsqrt(var + BN_EPS)
    out = norm * gamma[None, :, None] + beta[None, :, None]
    return jnp.maximum(out, 0.0)


if __name__ == "__main__":
    key = jax.random.PRNGKey(0)
    kx, kw, kb, kg, kbe = jax.random.split(key, 5)

    # --- f32 correctness check at small module-consistent shapes -------------
    N, Cin, Cout, L = 2, 4, 8, 16
    x = jax.random.normal(kx, (N, Cin, L), dtype=jnp.float32)
    weight = jax.random.normal(kw, (Cin, Cout, 2), dtype=jnp.float32) * 0.3
    bias = jax.random.normal(kb, (Cout,), dtype=jnp.float32) * 0.1
    gamma = 1.0 + 0.1 * jax.random.normal(kg, (Cout,), dtype=jnp.float32)
    beta = 0.1 * jax.random.normal(kbe, (Cout,), dtype=jnp.float32)

    out = jax.block_until_ready(deconv1d_bn_forward(x, weight, bias, gamma, beta))
    ref = _reference_forward(x, weight, bias, gamma, beta)
    assert out.shape == (N, Cout, 2 * L), out.shape
    assert jnp.allclose(out, ref, rtol=1e-4, atol=1e-4), "f32 mismatch vs reference"

    # --- bf16 check (fully fused interleave path; f32 accumulation) ----------
    N2, L2 = 2, 256
    x2 = jax.random.normal(kx, (N2, Cin, L2), dtype=jnp.float32).astype(jnp.bfloat16)
    w_bf = weight.astype(jnp.bfloat16)
    out2 = jax.block_until_ready(
        deconv1d_bn_forward(x2, w_bf, bias, gamma, beta))
    ref2 = _reference_forward(x2.astype(jnp.float32), w_bf.astype(jnp.float32),
                              bias, gamma, beta)
    assert out2.shape == (N2, Cout, 2 * L2), out2.shape
    assert jnp.allclose(out2.astype(jnp.float32), ref2, rtol=3e-2, atol=3e-2), \
        "bf16 mismatch vs reference"

    print("KERNEL_OK")
</pallas_src>

<mosaic_0001>
module attributes {stable_mosaic.version = 11 : i64} {
  func.func @_gram_stats_kernel(%arg0: i32, %arg1: i32, %arg2: memref<1x4x128xf32, #tpu.memory_space<vmem>>, %arg3: memref<1x4x4xf32, #tpu.memory_space<vmem>>, %arg4: memref<1x4x1xf32, #tpu.memory_space<vmem>>) attributes {dimension_semantics = [#tpu.dimension_semantics<parallel>, #tpu.dimension_semantics<arbitrary>], iteration_bounds = array<i64: 2, 1>, scalar_prefetch = 0 : i64, scratch_operands = 0 : i64, tpu.core_type = #tpu.core_type<tc>, window_params = [{transform_indices = @transform_0, window_bounds = array<i64: 1, 4, 128>}, {transform_indices = @transform_1, window_bounds = array<i64: 1, 4, 4>}, {transform_indices = @transform_2, window_bounds = array<i64: 1, 4, 1>}]} {
    %c0_i32 = arith.constant 0 : i32
    %0 = arith.cmpi eq, %arg1, %c0_i32 : i32
    %1 = arith.extui %0 : i1 to i32
    %c0_i32_0 = arith.constant 0 : i32
    %2 = arith.cmpi ne, %1, %c0_i32_0 : i32
    scf.if %2 {
      %cst_16 = arith.constant 0.000000e+00 : f32
      %20 = vector.broadcast %cst_16 : f32 to vector<1x4x4xf32>
      %c0_17 = arith.constant 0 : index
      %c0_18 = arith.constant 0 : index
      %c0_19 = arith.constant 0 : index
      %21 = vector.load %arg3[%c0_17, %c0_18, %c0_19] : memref<1x4x4xf32, #tpu.memory_space<vmem>>, vector<1x4x4xf32>
      tpu.vector_store %arg3[%c0_17, %c0_18, %c0_19], %20 {strides = array<i32>} : memref<1x4x4xf32, #tpu.memory_space<vmem>>, vector<1x4x4xf32>,
      %cst_20 = arith.constant 0.000000e+00 : f32
      %22 = vector.broadcast %cst_20 : f32 to vector<1x4x1xf32>
      %c0_21 = arith.constant 0 : index
      %c0_22 = arith.constant 0 : index
      %c0_23 = arith.constant 0 : index
      %23 = vector.load %arg4[%c0_21, %c0_22, %c0_23] : memref<1x4x1xf32, #tpu.memory_space<vmem>>, vector<1x4x1xf32>
      tpu.vector_store %arg4[%c0_21, %c0_22, %c0_23], %22 {strides = array<i32>} : memref<1x4x1xf32, #tpu.memory_space<vmem>>, vector<1x4x1xf32>,
    } else {
    }
    %c0 = arith.constant 0 : index
    %c0_1 = arith.constant 0 : index
    %c0_2 = arith.constant 0 : index
    %3 = vector.load %arg2[%c0, %c0_1, %c0_2] : memref<1x4x128xf32, #tpu.memory_space<vmem>>, vector<1x4x128xf32>
    %4 = vector.shape_cast %3 : vector<1x4x128xf32> to vector<4x128xf32>
    %c0_3 = arith.constant 0 : index
    %c0_4 = arith.constant 0 : index
    %c0_5 = arith.constant 0 : index
    %5 = vector.load %arg3[%c0_3, %c0_4, %c0_5] : memref<1x4x4xf32, #tpu.memory_space<vmem>>, vector<1x4x4xf32>
    %6 = vector.shape_cast %5 : vector<1x4x4xf32> to vector<4x4xf32>
    %cst = arith.constant dense<0.000000e+00> : vector<4x4xf32>
    %7 = tpu.matmul %4, %4, %cst {dimension_numbers = #tpu.dot_dimension_numbers<[1], [1], [0], [0], [0, 0, 1, 0], [], []>} : vector<4x128xf32>, vector<4x128xf32>, vector<4x4xf32> -> vector<4x4xf32>
    %8 = arith.addf %6, %7 : vector<4x4xf32>
    %c0_6 = arith.constant 0 : index
    %c0_7 = arith.constant 0 : index
    %c0_8 = arith.constant 0 : index
    %9 = vector.load %arg3[%c0_6, %c0_7, %c0_8] : memref<1x4x4xf32, #tpu.memory_space<vmem>>, vector<1x4x4xf32>
    %10 = vector.shape_cast %9 : vector<1x4x4xf32> to vector<4x4xf32>
    %11 = vector.shape_cast %8 : vector<4x4xf32> to vector<1x4x4xf32>
    tpu.vector_store %arg3[%c0_6, %c0_7, %c0_8], %11 {strides = array<i32>} : memref<1x4x4xf32, #tpu.memory_space<vmem>>, vector<1x4x4xf32>,
    %c0_9 = arith.constant 0 : index
    %c0_10 = arith.constant 0 : index
    %c0_11 = arith.constant 0 : index
    %12 = vector.load %arg4[%c0_9, %c0_10, %c0_11] : memref<1x4x1xf32, #tpu.memory_space<vmem>>, vector<1x4x1xf32>
    %13 = vector.shape_cast %12 : vector<1x4x1xf32> to vector<4x1xf32>
    %cst_12 = arith.constant dense<0.000000e+00> : vector<4xf32>
    %14 = vector.multi_reduction <add>, %4, %cst_12 [1] : vector<4x128xf32> to vector<4xf32>
    %15 = vector.shape_cast %14 : vector<4xf32> to vector<4x1xf32>
    %16 = arith.addf %13, %15 : vector<4x1xf32>
    %c0_13 = arith.constant 0 : index
    %c0_14 = arith.constant 0 : index
    %c0_15 = arith.constant 0 : index
    %17 = vector.load %arg4[%c0_13, %c0_14, %c0_15] : memref<1x4x1xf32, #tpu.memory_space<vmem>>, vector<1x4x1xf32>
    %18 = vector.shape_cast %17 : vector<1x4x1xf32> to vector<4x1xf32>
    %19 = vector.shape_cast %16 : vector<4x1xf32> to vector<1x4x1xf32>
    tpu.vector_store %arg4[%c0_13, %c0_14, %c0_15], %19 {strides = array<i32>} : memref<1x4x1xf32, #tpu.memory_space<vmem>>, vector<1x4x1xf32>,
    return
  }
  func.func @transform_0(%arg0: i32, %arg1: i32) -> (i32, i32, i32) {
    %c0_i32 = arith.constant 0 : i32
    %c0_i32_0 = arith.constant 0 : i32
    return %arg0, %c0_i32, %arg1 : i32, i32, i32
  }
  func.func @transform_1(%arg0: i32, %arg1: i32) -> (i32, i32, i32) {
    %c0_i32 = arith.constant 0 : i32
    %c0_i32_0 = arith.constant 0 : i32
    %c0_i32_1 = arith.constant 0 : i32
    return %arg0, %c0_i32, %c0_i32_0 : i32, i32, i32
  }
  func.func @transform_2(%arg0: i32, %arg1: i32) -> (i32, i32, i32) {
    %c0_i32 = arith.constant 0 : i32
    %c0_i32_0 = arith.constant 0 : i32
    %c0_i32_1 = arith.constant 0 : i32
    return %arg0, %c0_i32, %c0_i32_0 : i32, i32, i32
  }
}

module attributes {stable_mosaic.version = 11 : i64} {
  func.func @_apply_split_kernel(%arg0: i32, %arg1: i32, %arg2: memref<1x4x128xf32, #tpu.memory_space<vmem>>, %arg3: memref<16x4xf32, #tpu.memory_space<vmem>>, %arg4: memref<16x1xf32, #tpu.memory_space<vmem>>, %arg5: memref<16x1xf32, #tpu.memory_space<vmem>>, %arg6: memref<1x8x128xf32, #tpu.memory_space<vmem>>, %arg7: memref<1x8x128xf32, #tpu.memory_space<vmem>>) attributes {dimension_semantics = [#tpu.dimension_semantics<parallel>, #tpu.dimension_semantics<parallel>], iteration_bounds = array<i64: 2, 1>, scalar_prefetch = 0 : i64, scratch_operands = 0 : i64, tpu.core_type = #tpu.core_type<tc>, window_params = [{transform_indices = @transform_0, window_bounds = array<i64: 1, 4, 128>}, {pipeline_mode = #tpu.pipeline_mode<synchronous>, transform_indices = @transform_1, window_bounds = array<i64: 16, 4>}, {pipeline_mode = #tpu.pipeline_mode<synchronous>, transform_indices = @transform_2, window_bounds = array<i64: 16, 1>}, {pipeline_mode = #tpu.pipeline_mode<synchronous>, transform_indices = @transform_3, window_bounds = array<i64: 16, 1>}, {transform_indices = @transform_4, window_bounds = array<i64: 1, 8, 128>}, {transform_indices = @transform_5, window_bounds = array<i64: 1, 8, 128>}]} {
    %c0 = arith.constant 0 : index
    %c0_0 = arith.constant 0 : index
    %c0_1 = arith.constant 0 : index
    %0 = vector.load %arg2[%c0, %c0_0, %c0_1] : memref<1x4x128xf32, #tpu.memory_space<vmem>>, vector<1x4x128xf32>
    %1 = vector.shape_cast %0 : vector<1x4x128xf32> to vector<4x128xf32>
    %c0_2 = arith.constant 0 : index
    %c0_3 = arith.constant 0 : index
    %2 = vector.load %arg3[%c0_2, %c0_3] : memref<16x4xf32, #tpu.memory_space<vmem>>, vector<16x4xf32>
    %cst = arith.constant dense<0.000000e+00> : vector<16x128xf32>
    %3 = tpu.matmul %2, %1, %cst {dimension_numbers = #tpu.dot_dimension_numbers<[1], [0], [0], [1], [0, 0, 1, 1], [], []>} : vector<16x4xf32>, vector<4x128xf32>, vector<16x128xf32> -> vector<16x128xf32>
    %c0_4 = arith.constant 0 : index
    %c0_5 = arith.constant 0 : index
    %4 = vector.load %arg4[%c0_4, %c0_5] : memref<16x1xf32, #tpu.memory_space<vmem>>, vector<16x1xf32>
    %5 = vector.broadcast %4 : vector<16x1xf32> to vector<16x128xf32>
    %6 = arith.mulf %3, %5 : vector<16x128xf32>
    %c0_6 = arith.constant 0 : index
    %c0_7 = arith.constant 0 : index
    %7 = vector.load %arg5[%c0_6, %c0_7] : memref<16x1xf32, #tpu.memory_space<vmem>>, vector<16x1xf32>
    %8 = vector.broadcast %7 : vector<16x1xf32> to vector<16x128xf32>
    %9 = arith.addf %6, %8 : vector<16x128xf32>
    %cst_8 = arith.constant 0.000000e+00 : f32
    %10 = vector.broadcast %cst_8 : f32 to vector<16x128xf32>
    %11 = arith.maximumf %9, %10 : vector<16x128xf32>
    %12 = vector.extract_strided_slice %11 {offsets = [0, 0], sizes = [8, 128], strides = [1, 1]} : vector<16x128xf32> to vector<8x128xf32>
    %c0_9 = arith.constant 0 : index
    %c0_10 = arith.constant 0 : index
    %c0_11 = arith.constant 0 : index
    %13 = vector.load %arg6[%c0_9, %c0_10, %c0_11] : memref<1x8x128xf32, #tpu.memory_space<vmem>>, vector<1x8x128xf32>
    %14 = vector.shape_cast %13 : vector<1x8x128xf32> to vector<8x128xf32>
    %15 = vector.shape_cast %12 : vector<8x128xf32> to vector<1x8x128xf32>
    tpu.vector_store %arg6[%c0_9, %c0_10, %c0_11], %15 {strides = array<i32>} : memref<1x8x128xf32, #tpu.memory_space<vmem>>, vector<1x8x128xf32>,
    %16 = vector.extract_strided_slice %11 {offsets = [8, 0], sizes = [8, 128], strides = [1, 1]} : vector<16x128xf32> to vector<8x128xf32>
    %c0_12 = arith.constant 0 : index
    %c0_13 = arith.constant 0 : index
    %c0_14 = arith.constant 0 : index
    %17 = vector.load %arg7[%c0_12, %c0_13, %c0_14] : memref<1x8x128xf32, #tpu.memory_space<vmem>>, vector<1x8x128xf32>
    %18 = vector.shape_cast %17 : vector<1x8x128xf32> to vector<8x128xf32>
    %19 = vector.shape_cast %16 : vector<8x128xf32> to vector<1x8x128xf32>
    tpu.vector_store %arg7[%c0_12, %c0_13, %c0_14], %19 {strides = array<i32>} : memref<1x8x128xf32, #tpu.memory_space<vmem>>, vector<1x8x128xf32>,
    return
  }
  func.func @transform_0(%arg0: i32, %arg1: i32) -> (i32, i32, i32) {
    %c0_i32 = arith.constant 0 : i32
    %c0_i32_0 = arith.constant 0 : i32
    return %arg0, %c0_i32, %arg1 : i32, i32, i32
  }
  func.func @transform_1(%arg0: i32, %arg1: i32) -> (i32, i32) {
    %c0_i32 = arith.constant 0 : i32
    %c0_i32_0 = arith.constant 0 : i32
    %c0_i32_1 = arith.constant 0 : i32
    return %c0_i32, %c0_i32_0 : i32, i32
  }
  func.func @transform_2(%arg0: i32, %arg1: i32) -> (i32, i32) {
    %c0_i32 = arith.constant 0 : i32
    %c0_i32_0 = arith.constant 0 : i32
    %c0_i32_1 = arith.constant 0 : i32
    return %c0_i32, %c0_i32_0 : i32, i32
  }
  func.func @transform_3(%arg0: i32, %arg1: i32) -> (i32, i32) {
    %c0_i32 = arith.constant 0 : i32
    %c0_i32_0 = arith.constant 0 : i32
    %c0_i32_1 = arith.constant 0 : i32
    return %c0_i32, %c0_i32_0 : i32, i32
  }
  func.func @transform_4(%arg0: i32, %arg1: i32) -> (i32, i32, i32) {
    %c0_i32 = arith.constant 0 : i32
    %c0_i32_0 = arith.constant 0 : i32
    return %arg0, %c0_i32, %arg1 : i32, i32, i32
  }
  func.func @transform_5(%arg0: i32, %arg1: i32) -> (i32, i32, i32) {
    %c0_i32 = arith.constant 0 : i32
    %c0_i32_0 = arith.constant 0 : i32
    return %arg0, %c0_i32, %arg1 : i32, i32, i32
  }
}

</mosaic_0001>

<bundles_post_ra>
// kernel: tile.18
= control target key start
LH: loop header
LB: loop body
LE: loop exit
PB: predicated region body
PF: predicated region fallthrough
CT: control target
= control target key end

     0   :  { %s22_s0 = inlined_call_operand.vmem [shape: f32[8], index: 0, kind: input, shape index: {}]   ;;  %s23_s1 = inlined_call_operand.vmem [shape: f32[2,8], index: 1, kind: output, shape index: {}]  }
   0x1   :  { %v4_v0 = vld [vmem:[%s22_s0] ss:$0 sm:$0xff] }
   0x2   :  { %5 = vst [vmem:[%s23_s1] sm:$0x3] %v4_v0 }

// kernel: tile.0
= control target key start
LH: loop header
LB: loop body
LE: loop exit
PB: predicated region body
PF: predicated region fallthrough
CT: control target
= control target key end

     0   :  { %s66_s8 = smov 125   ;;  %vm7_vm0 = vcmask 7168   ;;  %s67_s11 = smov 126   ;;  %s117_s0 = inlined_call_operand.vmem [shape: f32[2,8], index: 0, kind: input, shape index: {}]   ;;  %s118_s1 = inlined_call_operand.vmem [shape: f32[16,1], index: 1, kind: output, shape index: {}]  }
   0x1   :  { %v4_v0 = vld [vmem:[%s117_s0] sm:$0x3]  ;;  %s65_s0 = smov 127   ;;  %s68_s12 = smov 124  }
   0x2   :  { %5 = vst [vmem:[#allocation0] sm:$0x3] %v4_v0  ;;  %s69_s13 = smov 123   ;;  %s70_s14 = smov 122  }
   0x3   :  { %s71_s15 = smov 121  }
   0x9   :  { %v9_v1 = vld [vmem:[#allocation0] sm:$0x3]  }
   0xa   :  { %v21_v2 = vld [vmem:[#allocation0] sm:$0x3]   ;;  %10 = vrot.lane.b32.xlu0 %v9_v1, %s65_s0 }
   0xb   :  { %22 = vrot.lane.b32.xlu1 %v21_v2, %s66_s8  ;;  %v15_v3 = vld [vmem:[#allocation0] sm:$0x3]  }
   0xc   :  { %v27_v4 = vld [vmem:[#allocation0] sm:$0x3]  }
   0xd   :  { %v6_v5 = vld [vmem:[#allocation0] sm:$0x3]  }
   0xe   :  { %8 = vst.msk [vmem:[%s118_s1] ss:$8 sm:$0x3] %vm7_vm0, %v6_v5   ;;  %16 = vrot.lane.b32.xlu0 %v15_v3, %s67_s11  ;;  %v33_v6 = vld [vmem:[#allocation0] sm:$0x3]  }
   0xf   :  { %28 = vrot.lane.b32.xlu1 %v27_v4, %s68_s12  ;;  %v39_v7 = vld [vmem:[#allocation0] sm:$0x3]  }
  0x10   :  { %v45_v8 = vld [vmem:[#allocation0] sm:$0x3]  }
  0x12   :  { %34 = vrot.lane.b32.xlu0 %v33_v6, %s69_s13 }
  0x13   :  { %40 = vrot.lane.b32.xlu1 %v39_v7, %s70_s14 }
  0x16   :  { %46 = vrot.lane.b32.xlu0 %v45_v8, %s71_s15 }
  0x7c   :  { %v11_v9 = vpop.permute.xlu0 %10  }
  0x7d   :  { %v23_v10 = vpop.permute.xlu1 %22   ;;  %51 = vst.msk [vmem:[%s118_s1 + $0x1] ss:$8 sm:$0x3] %vm7_vm0, %v11_v9  }
  0x7e   :  { %53 = vst.msk [vmem:[%s118_s1 + $0x3] ss:$8 sm:$0x3] %vm7_vm0, %v23_v10  }
  0x80   :  { %v17_v11 = vpop.permute.xlu0 %16  }
  0x81   :  { %v29_v12 = vpop.permute.xlu1 %28   ;;  %52 = vst.msk [vmem:[%s118_s1 + $0x2] ss:$8 sm:$0x3] %vm7_vm0, %v17_v11  }
  0x82   :  { %54 = vst.msk [vmem:[%s118_s1 + $0x4] ss:$8 sm:$0x3] %vm7_vm0, %v29_v12  }
  0x84   :  { %v35_v13 = vpop.permute.xlu0 %34  }
  0x85   :  { %v41_v14 = vpop.permute.xlu1 %40   ;;  %55 = vst.msk [vmem:[%s118_s1 + $0x5] ss:$8 sm:$0x3] %vm7_vm0, %v35_v13  }
  0x86   :  { %56 = vst.msk [vmem:[%s118_s1 + $0x6] ss:$8 sm:$0x3] %vm7_vm0, %v41_v14  }
  0x88   :  { %v47_v15 = vpop.permute.xlu0 %46  }
  0x89   :  { %57 = vst.msk [vmem:[%s118_s1 + $0x7] ss:$8 sm:$0x3] %vm7_vm0, %v47_v15  }

// kernel: deconv1d_bn_forward.2
= control target key start
LH: loop header
LB: loop body
LE: loop exit
PB: predicated region body
PF: predicated region fallthrough
CT: control target
= control target key end

     0   :  { %s443_s9 = smov 0   ;;  %s445_s10 = smov 0   ;;  %s481_s0 = inlined_call_operand.vmem [shape: f32[2,4,128], index: 0, kind: input, shape index: {}]   ;;  %s482_s1 = inlined_call_operand.vmem [shape: f32[2,4,4], index: 1, kind: output, shape index: {0}]   ;;  %s483_s2 = inlined_call_operand.vmem [shape: f32[2,4,1], index: 2, kind: output, shape index: {1}]  }
   0x1   :  { %s447_s11 = smov 0  }
   0x2 LB: > { %s25_s12 = sadd.s32 1, %s420_s10  ;;  %p363_p0 = scmp.ge.s32.totalorder %s424_s11, 1  ;;  %s424_s11 = sphi %s447_s11, %s13_s11   ;;  %s420_s10 = sphi %s445_s10, %s485_s10   ;;  %s416_s9 = sphi %s443_s9, %s484_s9  }
   0x3   : > { %p27_p1 = scmp.ge.s32.totalorder %s25_s12, 2  ;;  %p131_p2 = scmp.lt.s32.totalorder %s424_s11, 3 }
   0x5   : > { %s487_s12 = smov (%p27_p1, %s25_s12), 0  ;;  %p132_p3 = pnand %p363_p0, %p131_p2 }
   0x6   : > { %p158_p4 = scmp.lt.s32.totalorder (!%p132_p3), %s416_s9, 1  ;;  %v426_v0 = vmov (!%p132_p3), 0.0   ;;  %vm427_vm0 = vmmov (!%p132_p3), 0   ;;  %vm177_vm1 = vcmask (!%p132_p3), 27648   ;;  %vm257_vm2 = vcmask (!%p132_p3), 1043456  }
   0x7   : > { %135 = sbr.rel (%p132_p3) target bundleno = 236 (0xec), region = 24  ;;  %371 = vmatprep.subr.mxu0 (!%p132_p3), %v426_v0  ;;  %373 = vmatprep.mubr.msk.f32.mxu0 (!%p132_p3), %vm427_vm0, %v426_v0  ;;  %vm179_vm3 = vcmask (!%p132_p3), 3072  }
   0xe   : > { %s489_s9 = smov (!%p158_p4, %s416_s9), 1 }
   0xf   : > { %s364_s13 = sshll.u32 %s489_s9, 2 }
  0x10   : > { %s164_s16 = scalar_lea.vmem %s481_s0, %s364_s13  ;;  %s168_s19 = scalar_lea.vmem %s482_s1, %s364_s13 }
  0x11   : > { %v181_v1 = vld [vmem:[%s164_s16] sm:$0xf]  ;;  %178 = vst.msk [vmem:[%s168_s19] sm:$0xf] %vm177_vm1, %v426_v0  ;;  %s172_s22 = scalar_lea.vmem %s483_s2, %s364_s13 }
  0x12   : > { %372 = vmatpush3.xpose.msra.mxu0 %v181_v1  ;;  %v258_v2 = vsel %vm257_vm2, %v181_v1, 0.0  ;;  %180 = vst.msk [vmem:[%s172_s22] sm:$0xf] %vm179_vm3, %v426_v0 }
  0x13   : > { %259 = vadd.xlane.f32.xlu0 %v258_v2 }
  0x15   : > { %374 = vmatmul.mubr.f32.vlgmr.msra.gmra.mrb[0].mxu0 %v181_v1 }
  0x18   : > { %v182_v6 = vld [vmem:[%s168_s19] sm:$0xf] }
  0x19   : > { %v256_v3 = vld [vmem:[%s172_s22] sm:$0xf] }
  0xa0   : > { %v260_v4 = vpop.xlane.xlu0 %259 }
  0xa1   : > { %v261_v5 = vadd.f32 %v260_v4, %v256_v3 }
  0xa3   : > { %263 = vst.msk [vmem:[%s172_s22] sm:$0xf] %vm179_vm3, %v261_v5 }
  0xe8   : > { %v249_v7 = vpop.f32.mrb[0].mxu0 }
  0xe9   : > { %v253_v8 = vadd.f32 %v249_v7, %v182_v6  ;;  %v375_v9 = vpop.f32.mrb[1].mxu0 }
  0xeb   : > { %255 = vst.msk [vmem:[%s168_s19] sm:$0xf] %vm177_vm1, %v253_v8 }
  0xec PF: > { %s13_s11 = sadd.s32 1, %s424_s11   ;;  %s484_s9 = smov %s420_s10 }
  0xed   : > { %p10_p5 = scmp.ge.s32.totalorder %s13_s11, 4   ;;  %s485_s10 = smov %s487_s12 }
  0xef   :  { %12 = sbr.rel (!%p10_p5) target bundleno = 2 (0x2), region = 70 }

// kernel: deconv1d_bn_forward.3
= control target key start
LH: loop header
LB: loop body
LE: loop exit
PB: predicated region body
PF: predicated region fallthrough
CT: control target
= control target key end

     0   :  { %s609_s18 = smov 0   ;;  %s611_s19 = smov 0   ;;  %s669_s0 = inlined_call_operand.vmem [shape: f32[2,4,128], index: 0, kind: input, shape index: {}]   ;;  %s670_s1 = inlined_call_operand.vmem [shape: f32[16,4], index: 1, kind: input, shape index: {}]   ;;  %s671_s2 = inlined_call_operand.vmem [shape: f32[16,1], index: 2, kind: input, shape index: {}]   ;;  %s672_s3 = inlined_call_operand.vmem [shape: f32[16,1], index: 3, kind: input, shape index: {}]   ;;  %s673_s4 = inlined_call_operand.vmem [shape: f32[2,8,128], index: 4, kind: output, shape index: {0}]   ;;  %s674_s5 = inlined_call_operand.vmem [shape: f32[2,8,128], index: 5, kind: output, shape index: {1}]  }
   0x1   :  { %s613_s20 = smov 0  }
   0x2 LB: > { %s28_s21 = sadd.s32 1, %s572_s19  ;;  %p510_p0 = scmp.ge.s32.totalorder %s576_s20, 1  ;;  %s576_s20 = sphi %s613_s20, %s16_s20   ;;  %s572_s19 = sphi %s611_s19, %s676_s19   ;;  %s568_s18 = sphi %s609_s18, %s675_s18  }
   0x3   : > { %p30_p1 = scmp.ge.s32.totalorder %s28_s21, 2  ;;  %p210_p2 = scmp.lt.s32.totalorder %s576_s20, 3 }
   0x5   : > { %s678_s21 = smov (%p30_p1, %s28_s21), 0  ;;  %p211_p3 = pnand %p510_p0, %p210_p2 }
   0x6   : > { %p249_p4 = scmp.lt.s32.totalorder (!%p211_p3), %s568_s18, 1  ;;  %v271_v0 = vld [vmem:[%s670_s1] sm:$0xff] (!%p211_p3)  ;;  %vm273_vm0 = vcmask (!%p211_p3), 31744   ;;  %v578_v1 = vmov (!%p211_p3), 0   ;;  %v360_v4 = vld [vmem:[%s671_s2 + $0x8] sm:$0xff] (!%p211_p3)  ;;  %vm280_vm1 = vcmask (!%p211_p3), 1043456  }
   0x7   : > { %214 = sbr.rel (%p211_p3) target bundleno = 240 (0xf0), region = 36  ;;  %524 = vmatprep.mubr.msk.f32.mxu0 (!%p211_p3), %vm273_vm0, %v271_v0  ;;  %552 = vset.pattern.permute.xlu0 (!%p211_p3), %v578_v1  ;;  %v359_v2 = vld [vmem:[%s671_s2] sm:$0xff] (!%p211_p3)  ;;  %v374_v5 = vld [vmem:[%s672_s3 + $0x8] sm:$0xff] (!%p211_p3) }
   0x8   : > { %v373_v3 = vld [vmem:[%s672_s3] sm:$0xff] (!%p211_p3)  ;;  %363 = vperm.xlu0 (!%p211_p3), %552, %v359_v2   ;;  %553 = vset.pattern.permute.xlu1 (!%p211_p3), %v578_v1  ;;  %v272_v7 = vld [vmem:[%s670_s1 + $0x8] sm:$0xff] (!%p211_p3) }
   0x9   : > { %377 = vperm.xlu1 (!%p211_p3), %553, %v373_v3  }
   0xc   : > { %368 = vperm.xlu0 (!%p211_p3), %552, %v360_v4  }
   0xd   : > { %382 = vperm.xlu1 (!%p211_p3), %553, %v374_v5  }
   0xe   : > { %s680_s18 = smov (!%p249_p4, %s568_s18), 1 }
   0xf   : > { %s511_s30 = sshll.u32 %s680_s18, 2  ;;  %s512_s13 = sshll.u32 %s680_s18, 3 }
  0x10   : > { %s255_s10 = scalar_lea.vmem %s669_s0, %s511_s30  ;;  %s269_s16 = scalar_lea.vmem %s674_s5, %s512_s13 }
  0x11   : > { %v270_v6 = vld [vmem:[%s255_s10] sm:$0xf]  ;;  %s262_s23 = scalar_lea.vmem %s673_s4, %s512_s13 }
  0x12   : > { %522 = vmatprep.subr.msk.mxu0 %vm280_vm1, %v270_v6 }
  0x13   : > { %523 = vmatpush3.msk.msra.mxu0 %vm280_vm1, %v270_v6 }
  0x14   : > { %525 = vmatmul.mubr.msk.f32.vlgmr.msra.gmra.mrb[0].mxu0 %vm273_vm0, %v272_v7 }
  0x87   : > { %v364_v8 = vpop.permute.xlu0 %363 }
  0x88   : > { %v378_v9 = vpop.permute.xlu1 %377 }
  0x8b   : > { %v369_v10 = vpop.permute.xlu0 %368 }
  0x8c   : > { %v383_v14 = vpop.permute.xlu1 %382 }
  0xe7   : > { %v526_v11 = vpop.f32.mrb[0].mxu0 }
  0xe8   : > { %v372_v12 = vmul.f32 %v526_v11, %v369_v10  ;;  %v350_v13 = vpop.f32.mrb[1].mxu0 }
  0xe9   : > { %v371_v15 = vmul.f32 %v364_v8, %v350_v13 }
  0xea   : > { %v386_v16 = vadd.f32 %v383_v14, %v372_v12 }
  0xeb   : > { %v385_v17 = vadd.f32 %v378_v9, %v371_v15 }
  0xec   : > { %v388_v18 = vmax.f32 %v386_v16, 0.0 }
  0xed   : > { %v387_v19 = vmax.f32 %v385_v17, 0.0 }
  0xee   : > { %390 = vst [vmem:[%s269_s16] sm:$0xff] %v388_v18 }
  0xef   : > { %389 = vst [vmem:[%s262_s23] sm:$0xff] %v387_v19 }
  0xf0 PF: > { %s16_s20 = sadd.s32 1, %s576_s20   ;;  %s675_s18 = smov %s572_s19 }
  0xf1   : > { %p13_p5 = scmp.ge.s32.totalorder %s16_s20, 4   ;;  %s676_s19 = smov %s678_s21 }
  0xf3   :  { %15 = sbr.rel (!%p13_p5) target bundleno = 2 (0x2), region = 78 }

</bundles_post_ra>
